<compile_context>
chip_gen: v7x
topology: tpu7x:2x2x1
jax: 0.10.0
libtpu: 0.0.40
codegen_flags: <defaults>
</compile_context>

<pallas_src>
import functools

import jax
import jax.numpy as jnp
from jax.experimental import pallas as pl
from jax.experimental.pallas import tpu as pltpu


def _fem_kernel(x_ref, w_ref, b_ref, o_ref, *, H, W):
    """One image per grid step, fully fused double conv.

    x_ref: (1, Cin, H*W)   compute-dtype (bf16) input; channels on sublanes,
                           flattened space on lanes.
    w_ref: (Cout, 9*Cin)   folded conv+BN weights, column = (ky*3+kx)*Cin + cin.
    b_ref: (Cout, 1)       folded conv+BN bias (f32).
    o_ref: (1, Cout, H*W)  output (original dtype).
    """
    HW = H * W
    x = x_ref[0].astype(jnp.float32)      # (Cin, HW); shifts/fix-ups done in f32
    w = w_ref[...]                        # (Cout, 9*Cin), already in compute dtype
    b = b_ref[...]                        # (Cout, 1) f32

    # Boundary masks over the flattened spatial (lane) axis — hoisted, shared by
    # both conv passes.
    pos = jax.lax.broadcasted_iota(jnp.int32, (x.shape[0], HW), 1)
    col = pos % W
    first_col, last_col = col == 0, col == W - 1
    first_row, last_row = pos < W, pos >= (H - 1) * W

    def shift_rows(t, dy):
        # t[(y, x)] -> t[(clamp(y + dy), x)]   (replicate at top/bottom).
        if dy == 0:
            return t
        if dy == 1:
            return jnp.where(last_row, t, pltpu.roll(t, HW - W, axis=1))
        return jnp.where(first_row, t, pltpu.roll(t, W, axis=1))

    def shift_cols(t, dx):
        # t[(y, x)] -> t[(y, clamp(x + dx))]   (replicate at left/right).
        if dx == 0:
            return t
        if dx == 1:
            return jnp.where(last_col, t, pltpu.roll(t, HW - 1, axis=1))
        return jnp.where(first_col, t, pltpu.roll(t, 1, axis=1))

    def conv3x3(t):
        # 3x3 conv with replicate padding + folded BN bias, as a single MXU matmul:
        # stack the 9 shifted patches along the contraction axis -> (9*Cin, HW).
        rows = [shift_rows(t, dy) for dy in (-1, 0, 1)]
        patches = jnp.concatenate(
            [shift_cols(r, dx) for r in rows for dx in (-1, 0, 1)], axis=0)
        acc = jnp.dot(w, patches.astype(w.dtype),
                      preferred_element_type=jnp.float32)          # (Cout, HW) f32
        return acc + b

    y = jnp.maximum(conv3x3(x), 0.0)            # conv -> BN (folded) -> ReLU
    o_ref[0] = conv3x3(y).astype(o_ref.dtype)   # conv -> BN (folded), no ReLU


def fem_forward(x, conv_w, conv_b, bn_gamma, bn_beta, bn_mean, bn_var,
                eps=1e-5, compute_dtype=jnp.bfloat16):
    """x: (N, C, H, W) NCHW.  Returns (N, C, H, W), matching Fem.forward (eval-mode BN)."""
    N, Cin, H, W = x.shape
    Cout = conv_w.shape[0]
    assert Cin == Cout, "Fem applies the same conv twice; requires in_channel == out_channel"
    HW = H * W

    # Fold eval-mode BatchNorm (running stats) into the conv weights/bias.
    scale = bn_gamma / jnp.sqrt(bn_var + eps)                 # (Cout,)
    w_eff = conv_w * scale[:, None, None, None]               # (Cout, Cin, 3, 3)
    b_eff = (conv_b - bn_mean) * scale + bn_beta              # (Cout,)

    # Layout plumbing:
    #   x:      NCHW -> (N, C, H*W)    spatial axis lane-dense (pure reshape)
    #   weight: OIHW -> (Cout, 9*Cin)  column = (ky*3 + kx)*Cin + cin, matching the
    #                                  in-kernel patch stacking order.
    x_cf = x.reshape(N, Cin, HW).astype(compute_dtype)
    w2d = jnp.transpose(w_eff, (0, 2, 3, 1)).reshape(Cout, 9 * Cin).astype(compute_dtype)
    b_col = b_eff.reshape(Cout, 1).astype(jnp.float32)

    kernel = functools.partial(_fem_kernel, H=H, W=W)

    # VMEM budget from the actual blocks (double-buffered I/O + f32 intermediates),
    # clamped to stay within every generation's physical VMEM (v7x: 64 MiB/TC).
    cbytes = x_cf.dtype.itemsize
    in_block = Cin * HW * cbytes
    out_block = Cout * HW * x.dtype.itemsize
    scratch = (2 * 9 * Cin + 8 * Cin) * HW * 4   # patches (f32 + compute copy), x/y/acc/masks
    vmem_limit = int(min(max(2 * (in_block + out_block) + scratch + (4 << 20), 16 << 20),
                         48 << 20))

    cost = pl.CostEstimate(
        flops=2 * (2 * HW * 9 * Cin * Cout) * N,              # two 3x3 convs
        transcendentals=0,
        bytes_accessed=N * (in_block + out_block) + 9 * Cin * Cout * cbytes,
    )

    # TODO(synk): for very large H*W, add an H-tiled grid axis (4-row halos for the
    # fused double conv) so v7x's 64 MiB VMEM and both TensorCores are used at N=1.
    out_cf = pl.pallas_call(
        kernel,
        grid=(N,),
        in_specs=[
            pl.BlockSpec((1, Cin, HW), lambda n: (n, 0, 0)),      # one image per step
            pl.BlockSpec((Cout, 9 * Cin), lambda n: (0, 0)),      # weights: VMEM-resident
            pl.BlockSpec((Cout, 1), lambda n: (0, 0)),            # bias: VMEM-resident
        ],
        out_specs=pl.BlockSpec((1, Cout, HW), lambda n: (n, 0, 0)),
        out_shape=jax.ShapeDtypeStruct((N, Cout, HW), x.dtype),
        compiler_params=pltpu.CompilerParams(
            dimension_semantics=("parallel",),     # shard batch across TCs (v7x megacore)
            vmem_limit_bytes=vmem_limit,
        ),
        cost_estimate=cost,
    )(x_cf, w2d, b_col)

    return out_cf.reshape(N, Cout, H, W)


def _reference(x, conv_w, conv_b, gamma, beta, mean, var, eps=1e-5):
    """Pure-JAX mirror of the PyTorch forward (eval-mode BN) for sanity checking."""
    def rep_pad(t):
        return jnp.pad(t, ((0, 0), (0, 0), (1, 1), (1, 1)), mode="edge")

    def conv(t):
        y = jax.lax.conv_general_dilated(
            t, conv_w, window_strides=(1, 1), padding="VALID",
            dimension_numbers=("NCHW", "OIHW", "NCHW"),
            precision=jax.lax.Precision.HIGHEST)
        return y + conv_b[None, :, None, None]

    def bn(t):
        s = (gamma / jnp.sqrt(var + eps))[None, :, None, None]
        return (t - mean[None, :, None, None]) * s + beta[None, :, None, None]

    out = bn(conv(rep_pad(x)))
    out = jnp.maximum(out, 0.0)
    out = bn(conv(rep_pad(out)))
    return out


if __name__ == "__main__":
    key = jax.random.PRNGKey(0)
    kx, kw, kb, kg, kbe, km, kv = jax.random.split(key, 7)

    N, C, H, W = 2, 4, 16, 16
    x = jax.random.normal(kx, (N, C, H, W), jnp.float32)
    conv_w = 0.1 * jax.random.normal(kw, (C, C, 3, 3), jnp.float32)
    conv_b = 0.1 * jax.random.normal(kb, (C,), jnp.float32)
    bn_gamma = 1.0 + 0.1 * jax.random.normal(kg, (C,), jnp.float32)
    bn_beta = 0.1 * jax.random.normal(kbe, (C,), jnp.float32)
    bn_mean = 0.1 * jax.random.normal(km, (C,), jnp.float32)
    bn_var = 0.5 + jnp.abs(jax.random.normal(kv, (C,), jnp.float32))

    out = fem_forward(x, conv_w, conv_b, bn_gamma, bn_beta, bn_mean, bn_var)
    out = jax.block_until_ready(out)

    ref = _reference(x, conv_w, conv_b, bn_gamma, bn_beta, bn_mean, bn_var)
    err = float(jnp.max(jnp.abs(out - ref)))
    assert out.shape == (N, C, H, W)
    # bf16 MXU operands / bf16 input DMA (with f32 accumulation) bound the accuracy.
    assert jnp.allclose(out, ref, atol=2e-2, rtol=2e-2), err

    print("KERNEL_OK")
</pallas_src>

<mosaic_0001>
module attributes {stable_mosaic.version = 11 : i64} {
  func.func @_fem_kernel(%arg0: i32, %arg1: memref<1x4x256xbf16, #tpu.memory_space<vmem>>, %arg2: memref<4x36xbf16, #tpu.memory_space<vmem>>, %arg3: memref<4x1xf32, #tpu.memory_space<vmem>>, %arg4: memref<1x4x256xf32, #tpu.memory_space<vmem>>) attributes {dimension_semantics = [#tpu.dimension_semantics<parallel>], iteration_bounds = array<i64: 2>, scalar_prefetch = 0 : i64, scratch_operands = 0 : i64, tpu.core_type = #tpu.core_type<tc>, window_params = [{transform_indices = @transform_0, window_bounds = array<i64: 1, 4, 256>}, {pipeline_mode = #tpu.pipeline_mode<synchronous>, transform_indices = @transform_1, window_bounds = array<i64: 4, 36>}, {pipeline_mode = #tpu.pipeline_mode<synchronous>, transform_indices = @transform_2, window_bounds = array<i64: 4, 1>}, {transform_indices = @transform_3, window_bounds = array<i64: 1, 4, 256>}]} {
    %c0 = arith.constant 0 : index
    %c0_0 = arith.constant 0 : index
    %c0_1 = arith.constant 0 : index
    %0 = vector.load %arg1[%c0, %c0_0, %c0_1] : memref<1x4x256xbf16, #tpu.memory_space<vmem>>, vector<1x4x256xbf16>
    %1 = vector.shape_cast %0 : vector<1x4x256xbf16> to vector<4x256xbf16>
    %2 = arith.extf %1 : vector<4x256xbf16> to vector<4x256xf32>
    %c0_2 = arith.constant 0 : index
    %c0_3 = arith.constant 0 : index
    %3 = vector.load %arg2[%c0_2, %c0_3] : memref<4x36xbf16, #tpu.memory_space<vmem>>, vector<4x36xbf16>
    %c0_4 = arith.constant 0 : index
    %c0_5 = arith.constant 0 : index
    %4 = vector.load %arg3[%c0_4, %c0_5] : memref<4x1xf32, #tpu.memory_space<vmem>>, vector<4x1xf32>
    %5 = tpu.iota {dimensions = array<i32: 1>} : vector<4x256xi32>
    %c16_i32 = arith.constant 16 : i32
    %c0_i32 = arith.constant 0 : i32
    %6 = arith.cmpi eq, %c16_i32, %c0_i32 : i32
    %c1_i32 = arith.constant 1 : i32
    %7 = arith.select %6, %c1_i32, %c16_i32 : i32
    %8 = vector.broadcast %7 : i32 to vector<4x256xi32>
    %9 = arith.remsi %5, %8 : vector<4x256xi32>
    %c0_i32_6 = arith.constant 0 : i32
    %10 = vector.broadcast %c0_i32_6 : i32 to vector<4x256xi32>
    %11 = arith.cmpi ne, %9, %10 : vector<4x256xi32>
    %c0_i32_7 = arith.constant 0 : i32
    %12 = vector.broadcast %c0_i32_7 : i32 to vector<4x256xi32>
    %13 = arith.cmpi slt, %9, %12 : vector<4x256xi32>
    %c0_i32_8 = arith.constant 0 : i32
    %14 = arith.cmpi slt, %7, %c0_i32_8 : i32
    %15 = vector.broadcast %14 : i1 to vector<4x256xi1>
    %16 = vector.broadcast %15 : vector<4x256xi1> to vector<4x256xi1>
    %17 = arith.xori %13, %16 : vector<4x256xi1>
    %18 = arith.andi %17, %11 : vector<4x256xi1>
    %19 = vector.broadcast %7 : i32 to vector<4x256xi32>
    %20 = arith.addi %9, %19 : vector<4x256xi32>
    %21 = arith.select %18, %20, %9 : vector<4x256xi1>, vector<4x256xi32>
    %c0_i32_9 = arith.constant 0 : i32
    %22 = vector.broadcast %c0_i32_9 : i32 to vector<4x256xi32>
    %23 = arith.cmpi eq, %21, %22 : vector<4x256xi32>
    %c15_i32 = arith.constant 15 : i32
    %24 = vector.broadcast %c15_i32 : i32 to vector<4x256xi32>
    %25 = arith.cmpi eq, %21, %24 : vector<4x256xi32>
    %c16_i32_10 = arith.constant 16 : i32
    %26 = vector.broadcast %c16_i32_10 : i32 to vector<4x256xi32>
    %27 = arith.cmpi slt, %5, %26 : vector<4x256xi32>
    %c240_i32 = arith.constant 240 : i32
    %28 = vector.broadcast %c240_i32 : i32 to vector<4x256xi32>
    %29 = arith.cmpi sge, %5, %28 : vector<4x256xi32>
    %c16_i32_11 = arith.constant 16 : i32
    %30 = tpu.dynamic_rotate %2 by %c16_i32_11 dim 1 : vector<4x256xf32>, i32 -> vector<4x256xf32>
    %31 = arith.select %27, %2, %30 : vector<4x256xi1>, vector<4x256xf32>
    %c240_i32_12 = arith.constant 240 : i32
    %32 = tpu.dynamic_rotate %2 by %c240_i32_12 dim 1 : vector<4x256xf32>, i32 -> vector<4x256xf32>
    %33 = arith.select %29, %2, %32 : vector<4x256xi1>, vector<4x256xf32>
    %c1_i32_13 = arith.constant 1 : i32
    %34 = tpu.dynamic_rotate %31 by %c1_i32_13 dim 1 : vector<4x256xf32>, i32 -> vector<4x256xf32>
    %35 = arith.select %23, %31, %34 : vector<4x256xi1>, vector<4x256xf32>
    %c255_i32 = arith.constant 255 : i32
    %36 = tpu.dynamic_rotate %31 by %c255_i32 dim 1 : vector<4x256xf32>, i32 -> vector<4x256xf32>
    %37 = arith.select %25, %31, %36 : vector<4x256xi1>, vector<4x256xf32>
    %c1_i32_14 = arith.constant 1 : i32
    %38 = tpu.dynamic_rotate %2 by %c1_i32_14 dim 1 : vector<4x256xf32>, i32 -> vector<4x256xf32>
    %39 = arith.select %23, %2, %38 : vector<4x256xi1>, vector<4x256xf32>
    %c255_i32_15 = arith.constant 255 : i32
    %40 = tpu.dynamic_rotate %2 by %c255_i32_15 dim 1 : vector<4x256xf32>, i32 -> vector<4x256xf32>
    %41 = arith.select %25, %2, %40 : vector<4x256xi1>, vector<4x256xf32>
    %c1_i32_16 = arith.constant 1 : i32
    %42 = tpu.dynamic_rotate %33 by %c1_i32_16 dim 1 : vector<4x256xf32>, i32 -> vector<4x256xf32>
    %43 = arith.select %23, %33, %42 : vector<4x256xi1>, vector<4x256xf32>
    %c255_i32_17 = arith.constant 255 : i32
    %44 = tpu.dynamic_rotate %33 by %c255_i32_17 dim 1 : vector<4x256xf32>, i32 -> vector<4x256xf32>
    %45 = arith.select %25, %33, %44 : vector<4x256xi1>, vector<4x256xf32>
    %46 = tpu.concatenate %35, %31, %37, %39, %2, %41, %43, %33, %45 in 0 : vector<4x256xf32>, vector<4x256xf32>, vector<4x256xf32>, vector<4x256xf32>, vector<4x256xf32>, vector<4x256xf32>, vector<4x256xf32>, vector<4x256xf32>, vector<4x256xf32> -> vector<36x256xf32>
    %47 = arith.truncf %46 : vector<36x256xf32> to vector<36x256xbf16>
    %cst = arith.constant dense<0.000000e+00> : vector<4x256xf32>
    %48 = tpu.matmul %3, %47, %cst {dimension_numbers = #tpu.dot_dimension_numbers<[1], [0], [0], [1], [0, 0, 1, 1], [], []>} : vector<4x36xbf16>, vector<36x256xbf16>, vector<4x256xf32> -> vector<4x256xf32>
    %49 = vector.broadcast %4 : vector<4x1xf32> to vector<4x256xf32>
    %50 = arith.addf %48, %49 : vector<4x256xf32>
    %cst_18 = arith.constant 0.000000e+00 : f32
    %51 = vector.broadcast %cst_18 : f32 to vector<4x256xf32>
    %52 = arith.maximumf %50, %51 : vector<4x256xf32>
    %c16_i32_19 = arith.constant 16 : i32
    %53 = tpu.dynamic_rotate %52 by %c16_i32_19 dim 1 : vector<4x256xf32>, i32 -> vector<4x256xf32>
    %54 = arith.select %27, %52, %53 : vector<4x256xi1>, vector<4x256xf32>
    %c240_i32_20 = arith.constant 240 : i32
    %55 = tpu.dynamic_rotate %52 by %c240_i32_20 dim 1 : vector<4x256xf32>, i32 -> vector<4x256xf32>
    %56 = arith.select %29, %52, %55 : vector<4x256xi1>, vector<4x256xf32>
    %c1_i32_21 = arith.constant 1 : i32
    %57 = tpu.dynamic_rotate %54 by %c1_i32_21 dim 1 : vector<4x256xf32>, i32 -> vector<4x256xf32>
    %58 = arith.select %23, %54, %57 : vector<4x256xi1>, vector<4x256xf32>
    %c255_i32_22 = arith.constant 255 : i32
    %59 = tpu.dynamic_rotate %54 by %c255_i32_22 dim 1 : vector<4x256xf32>, i32 -> vector<4x256xf32>
    %60 = arith.select %25, %54, %59 : vector<4x256xi1>, vector<4x256xf32>
    %c1_i32_23 = arith.constant 1 : i32
    %61 = tpu.dynamic_rotate %52 by %c1_i32_23 dim 1 : vector<4x256xf32>, i32 -> vector<4x256xf32>
    %62 = arith.select %23, %52, %61 : vector<4x256xi1>, vector<4x256xf32>
    %c255_i32_24 = arith.constant 255 : i32
    %63 = tpu.dynamic_rotate %52 by %c255_i32_24 dim 1 : vector<4x256xf32>, i32 -> vector<4x256xf32>
    %64 = arith.select %25, %52, %63 : vector<4x256xi1>, vector<4x256xf32>
    %c1_i32_25 = arith.constant 1 : i32
    %65 = tpu.dynamic_rotate %56 by %c1_i32_25 dim 1 : vector<4x256xf32>, i32 -> vector<4x256xf32>
    %66 = arith.select %23, %56, %65 : vector<4x256xi1>, vector<4x256xf32>
    %c255_i32_26 = arith.constant 255 : i32
    %67 = tpu.dynamic_rotate %56 by %c255_i32_26 dim 1 : vector<4x256xf32>, i32 -> vector<4x256xf32>
    %68 = arith.select %25, %56, %67 : vector<4x256xi1>, vector<4x256xf32>
    %69 = tpu.concatenate %58, %54, %60, %62, %52, %64, %66, %56, %68 in 0 : vector<4x256xf32>, vector<4x256xf32>, vector<4x256xf32>, vector<4x256xf32>, vector<4x256xf32>, vector<4x256xf32>, vector<4x256xf32>, vector<4x256xf32>, vector<4x256xf32> -> vector<36x256xf32>
    %70 = arith.truncf %69 : vector<36x256xf32> to vector<36x256xbf16>
    %cst_27 = arith.constant dense<0.000000e+00> : vector<4x256xf32>
    %71 = tpu.matmul %3, %70, %cst_27 {dimension_numbers = #tpu.dot_dimension_numbers<[1], [0], [0], [1], [0, 0, 1, 1], [], []>} : vector<4x36xbf16>, vector<36x256xbf16>, vector<4x256xf32> -> vector<4x256xf32>
    %72 = vector.broadcast %4 : vector<4x1xf32> to vector<4x256xf32>
    %73 = arith.addf %71, %72 : vector<4x256xf32>
    %c0_28 = arith.constant 0 : index
    %c0_29 = arith.constant 0 : index
    %c0_30 = arith.constant 0 : index
    %74 = vector.load %arg4[%c0_28, %c0_29, %c0_30] : memref<1x4x256xf32, #tpu.memory_space<vmem>>, vector<1x4x256xf32>
    %75 = vector.shape_cast %74 : vector<1x4x256xf32> to vector<4x256xf32>
    %76 = vector.shape_cast %73 : vector<4x256xf32> to vector<1x4x256xf32>
    tpu.vector_store %arg4[%c0_28, %c0_29, %c0_30], %76 {strides = array<i32>} : memref<1x4x256xf32, #tpu.memory_space<vmem>>, vector<1x4x256xf32>,
    return
  }
  func.func @transform_0(%arg0: i32) -> (i32, i32, i32) {
    %c0_i32 = arith.constant 0 : i32
    %c0_i32_0 = arith.constant 0 : i32
    %c0_i32_1 = arith.constant 0 : i32
    return %arg0, %c0_i32, %c0_i32_0 : i32, i32, i32
  }
  func.func @transform_1(%arg0: i32) -> (i32, i32) {
    %c0_i32 = arith.constant 0 : i32
    %c0_i32_0 = arith.constant 0 : i32
    %c0_i32_1 = arith.constant 0 : i32
    return %c0_i32, %c0_i32_0 : i32, i32
  }
  func.func @transform_2(%arg0: i32) -> (i32, i32) {
    %c0_i32 = arith.constant 0 : i32
    %c0_i32_0 = arith.constant 0 : i32
    %c0_i32_1 = arith.constant 0 : i32
    return %c0_i32, %c0_i32_0 : i32, i32
  }
  func.func @transform_3(%arg0: i32) -> (i32, i32, i32) {
    %c0_i32 = arith.constant 0 : i32
    %c0_i32_0 = arith.constant 0 : i32
    %c0_i32_1 = arith.constant 0 : i32
    return %arg0, %c0_i32, %c0_i32_0 : i32, i32, i32
  }
}

</mosaic_0001>

<bundles_post_ra>
// kernel: tpu_custom_call.1
= control target key start
LH: loop header
LB: loop body
LE: loop exit
PB: predicated region body
PF: predicated region fallthrough
CT: control target
= control target key end

     0   :  { %8 = vsyncpa [#allocation3], 0  ;;  %s1341_s0 = inlined_call_operand.hbm [shape: bf16[2,4,256], index: 0, kind: input, shape index: {}]   ;;  %s1342_s1 = inlined_call_operand.vmem [shape: bf16[4,36], index: 1, kind: input, shape index: {}]   ;;  %s1343_s2 = inlined_call_operand.vmem [shape: f32[4,1], index: 2, kind: input, shape index: {}]   ;;  %s1344_s3 = inlined_call_operand.hbm [shape: f32[2,4,256], index: 3, kind: output, shape index: {}]  }
   0x1   :  { %10 = vsyncpa [#allocation3 + $0x1], 0 }
   0x2   :  { %11 = vsyncpa [#allocation4], 0 }
   0x3   :  { %13 = vsyncpa [#allocation4 + $0x1], 0  ;;  %s911_s12 = smov 0   ;;  %s913_s13 = smov 0  }
   0x4   :  { %s915_s14 = smov 0   ;;  %s917_s15 = smov 0  }
   0x5 LB: > { %s932_s16 = sadd.s32 4294967295, %s882_s15   ;;  %s634_s17 = sadd.s32 4294967294, %s882_s15   ;;  %s882_s15 = sphi %s917_s15, %s1367_s15   ;;  %s878_s14 = sphi %s915_s14, %s1366_s14   ;;  %s874_s13 = sphi %s913_s13, %s1365_s13   ;;  %s870_s12 = sphi %s911_s12, %s1364_s12  }
   0x6   : > { %s936_s18 = sadd.s32 1, %s882_s15   ;;  %s26_s19 = sadd.s32 1, %s878_s14 }
   0x7   : > { %s23_s20 = ssub.s32 %s882_s15, %s936_s18  ;;  %p33_p0 = scmp.ne.s32.totalorder %s878_s14, %s874_s13 }
   0x8   : > { %p24_p1 = scmp.eq.s32.totalorder %s23_s20, 0  ;;  %p34_p2 = scmp.eq.s32.totalorder %s882_s15, 0 }
   0x9   : > { %p39_p3 = scmp.ne.s32.totalorder %s874_s13, %s870_s12  ;;  %p40_p4 = scmp.eq.s32.totalorder %s932_s16, 0 }
   0xa   : > { %s948_s21 = scalar_select %p24_p1, %s878_s14, %s26_s19  }
   0xb   : > { %p950_p5 = por %p34_p2, %p33_p0  ;;  %p954_p6 = por %p40_p4, %p39_p3 }
   0xc   : > { %p105_p7 = scmp.eq.s32.totalorder %s932_s16, 1  ;;  %p111_p8 = scmp.eq.s32.totalorder %s634_s17, 1 }
   0xd   : > { %p666_p10 = scmp.lt.s32.totalorder %s882_s15, 2  ;;  %s137_s26 = sand.u32 1, %s878_s14  }
   0xe   : > { %p961_p11 = por %p105_p7, %p33_p0  ;;  %p965_p12 = por %p111_p8, %p39_p3 }
   0xf   : > { %s652_s27 = sshll.u32 %s882_s15, 6  ;;  %s637_s28 = sshll.u32 %s137_s26, 2 }
  0x10   : > { %s1348_s24 = scalar_select %p961_p11, 1, 0 }
  0x11   : > { %s1349_s25 = scalar_select %p965_p12, 1, 0 }
  0x12   : > { %s974_s4 = scalar_lea.hbm %s1341_s0, %s652_s27  ;;  %s141_s5 = scalar_lea.vmem [#allocation2], %s637_s28 }
  0x13   : > { %s149_s6 = sshll.u32 %s141_s5, 4  ;;  %p978_p13 = pnand %p666_p10, %p950_p5  ;;  %s982_s6 = int_to_ptr.vmem [resolvable:$true] %s149_s6 }
  0x14   : > { %s138_s8 = scalar_lea.sflag [#allocation3], %s137_s26  ;;  %s786_s9 = scalar_lea.hbm %s974_s4, 64 }
  0x15   : > { %p787_p2 = scmp.ne.s32.totalorder %s974_s4, %s786_s9  ;;  %p788_p3 = pneg %p978_p13 }
  0x16   : > { %s791_s17 = scalar_lea.hbm %s1341_s0, 128  ;;  %p792_p5 = scmp.lt.u32.totalorder %s974_s4, %s1341_s0 }
  0x17   : > { %p789_p4 = pnand %p788_p3, %p787_p2  ;;  %p793_p8 = scmp.lt.u32.totalorder %s791_s17, %s786_s9 }
  0x18   : > { %p795_p9 = scmp.lt.u32.totalorder %s786_s9, %s974_s4 }
  0x19   : > { %p790_p7 = pneg %p789_p4  ;;  %p794_p10 = por %p793_p8, %p792_p5 }
  0x1b   : > { %p796_p0 = por %p795_p9, %p794_p10 }
  0x1d   : > { %p797_p1 = pnand %p796_p0, %p790_p7 }
  0x1f   : > { %800 = shalt.err (!%p797_p1)
}
  0x20   : > { %s801_s22 = scalar_lea.vmem %s982_s6, 64  ;;  %s884_s26 = smov [#allocation2]  }
  0x21   : > { %p802_p2 = scmp.ne.s32.totalorder %s982_s6, %s801_s22  ;;  %s806_s27 = sshll.u32 %s884_s26, 4  ;;  %s807_s27 = int_to_ptr.vmem [resolvable:$false] %s806_s27 }
  0x22   : > { %s808_s28 = scalar_lea.vmem %s807_s27, 128  ;;  %p809_p11 = scmp.lt.s32.totalorder %s982_s6, %s807_s27 }
  0x23   : > { %p804_p4 = pnand %p802_p2, %p788_p3  ;;  %p810_p5 = scmp.lt.s32.totalorder %s808_s28, %s801_s22 }
  0x25   : > { %p805_p12 = pneg %p804_p4  ;;  %p811_p8 = por %p810_p5, %p809_p11 }
  0x27   : > { %p812_p9 = pnand %p811_p8, %p805_p12 }
  0x29   : > { %815 = shalt.err (!%p812_p9)
}
  0x2a   : > { %661 = dma.hbm_to_vmem [thread:$0]  (!%p978_p13), %s974_s4, 64, %s982_s6, %s138_s8  }
  0x2b   : > { %p1351_p0 = scmp.lt.s32.totalorder %s882_s15, 3  ;;  %p1352_p1 = scmp.ge.s32.totalorder %s882_s15, 1 }
  0x2d   : > { %p155_p3 = pnand %p1352_p1, %p1351_p0 }
  0x2e   : > { %s1016_s29 = sand.u32 (!%p155_p3), 1, %s874_s13  }
  0x2f   : > { %158 = sbr.rel (%p155_p3) target bundleno = 1026 (0x402), region = 32  ;;  %s641_s30 = sshll.u32 (!%p155_p3), %s1016_s29, 2 }
  0x30   : > { %s161_s5 = scalar_lea.sflag (!%p155_p3), [#allocation3], %s1016_s29  ;;  %s164_s9 = scalar_lea.vmem (!%p155_p3), [#allocation2], %s641_s30 }
  0x36   : > { %861 = dma.done.wait (%p954_p6), %s161_s5, 64  }
  0x37   : > { %863 = vsyncadd (%p954_p6), %s161_s5, 4294967232  ;;  %v188_v0 = vld [vmem:[%s164_s9] sm:$0xf]  ;;  %s885_s4 = smov 16   ;;  %s886_s6 = smov 1   ;;  %v192_v4 = vlaneseq  ;;  %v889_v21 = vmov 0  }
  0x38   : > { %v1024_v1 = vunpack.c.l.bf16 %v188_v0  ;;  %s887_s7 = smov 112   ;;  %s888_s23 = smov 127   ;;  %384 = vmatprep.mubr.bf16.mxu0 %v889_v21  ;;  %745 = vset.pattern.permute.xlu0 %v889_v21  ;;  %v191_v22 = vld [vmem:[%s1343_s2] sm:$0xf]  ;;  %vm321_vm9 = vcmask 1043456   ;;  %vm345_vm10 = vcmask 1041408  }
  0x39   : > { %v1035_v5 = vand.u32 127, %v192_v4  ;;  %535 = vmatprep.mubr.bf16.mxu1 %v889_v21  ;;  %vm341_vm11 = vcmask 293888   ;;  %s642_s19 = sshll.u32 %s1016_s29, 3  ;;  %s653_s20 = sshll.u32 %s932_s16, 7 }
  0x3a   : > { %v1028_v2 = vcombine.high %v1024_v1, %v1024_v1  ;;  %s186_s22 = scalar_lea.vmem [#allocation5], %s642_s19  ;;  %s1297_s30 = scalar_lea.hbm %s1344_s3, %s653_s20 }
  0x3b   : > { %vm223_vm0 = vcmp.lt.s32.totalorder %v1035_v5, 16  ;;  %v1039_v7 = vadd.s32 128, %v1035_v5  ;;  %vm242_vm2 = vcmp.lt.s32.totalorder %v1035_v5, 112  ;;  %v199_v27 = vand.u32 15, %v1035_v5  ;;  %s564_s26 = sshll.u32 %s186_s22, 4  ;;  %s550_s5 = scalar_lea.sflag [#allocation4], %s1016_s29  ;;  %s1299_s26 = int_to_ptr.vmem [resolvable:$true] %s564_s26 }
  0x3c   : > { %v705_v3 = vpack.i.bf16 %v1028_v2, %v1024_v1  ;;  %vm251_vm3 = vcmp.lt.s32.totalorder %v1035_v5, 1  ;;  %vm260_vm6 = vcmp.lt.s32.totalorder %v1035_v5, 127  ;;  %s816_s16 = scalar_lea.vmem %s1299_s26, 128  ;;  %p1361_p11 = scmp.ne.s32.totalorder %s1348_s24, 0 }
  0x3d   : > { %vm226_vm1 = vcmp.ge.s32.totalorder %v1039_v7, 240  ;;  %v206_v24 = vand.u32 15, %v1039_v7  ;;  %vm1088_vm5 = vcmp.eq.s32.totalorder %v199_v27, 0  ;;  %vm1099_vm7 = vcmp.eq.s32.totalorder %v199_v27, 15  ;;  %p817_p6 = scmp.ne.s32.totalorder %s1299_s26, %s816_s16  ;;  %s890_s9 = smov [#allocation5]  }
  0x3e   : > { %706 = vrot.lane.b32.xlu0 %v705_v3, %s885_s4  ;;  %716 = vrot.lane.b32.xlu1 %v705_v3, %s886_s6 }
  0x3f   : > { %vm1084_vm4 = vcmp.eq.s32.totalorder %v206_v24, 0  ;;  %vm1103_vm8 = vcmp.eq.s32.totalorder %v206_v24, 15  ;;  %p818_p12 = pnand %p817_p6, %p1361_p11 }
  0x41   : > { %p819_p13 = pneg %p818_p12 }
  0x42   : > { %711 = vrot.lane.b32.xlu0 %v705_v3, %s887_s7 }
  0xb0   : > { %v707_v6 = vpop.permute.xlu0 %706  ;;  %v717_v23 = vpop.permute.xlu1 %716 }
  0xb1   : > { %v709_v8 = vunpack.i.h.bf16 %v707_v6  ;;  %v708_v9 = vunpack.i.l.bf16 %v707_v6  ;;  %v719_v25 = vunpack.i.h.bf16 %v717_v23  ;;  %v718_v26 = vunpack.i.l.bf16 %v717_v23 }
  0xb3   : > { %v1043_v10 = vsel %vm223_vm0, %v708_v9, %v709_v8  ;;  %v235_v11 = vsel %vm223_vm0, %v709_v8, %v708_v9  ;;  %v269_v28 = vsel %vm251_vm3, %v718_v26, %v719_v25  ;;  %v270_v29 = vsel %vm251_vm3, %v719_v25, %v718_v26 }
  0xb4   : > { %v1050_v12 = vsel %vm223_vm0, %v1024_v1, %v235_v11  ;;  %v712_v13 = vpop.permute.xlu0 %711  ;;  %v272_v32 = vsel %vm1084_vm4, %v1028_v2, %v269_v28  ;;  %v271_v33 = vsel %vm1088_vm5, %v1024_v1, %v270_v29  ;;  %v300_v38 = vrot.slane %v1043_v10, 4 }
  0xb5   : > { %v714_v14 = vunpack.i.h.bf16 %v712_v13  ;;  %v713_v15 = vunpack.i.l.bf16 %v712_v13  ;;  %v730_v16 = vpack.i.bf16 %v1043_v10, %v1050_v12  ;;  %v306_v43 = vrot.slane %v272_v32, 4 }
  0xb6   : > { %v299_v44 = vrot.slane %v1050_v12, 4  ;;  %v305_v45 = vrot.slane %v271_v33, 4 }
  0xb7   : > { %v1058_v17 = vsel %vm242_vm2, %v713_v15, %v714_v14  ;;  %v244_v18 = vsel %vm242_vm2, %v714_v14, %v713_v15  ;;  %731 = vrot.lane.b32.xlu0 %v730_v16, %s888_s23  ;;  %721 = vrot.lane.b32.xlu1 %v730_v16, %s886_s6 }
  0xb8   : > { %v1067_v19 = vsel %vm226_vm1, %v1028_v2, %v244_v18 }
  0xb9   : > { %v735_v20 = vpack.i.bf16 %v1067_v19, %v1058_v17  ;;  %v318_v46 = vrot.slane %v1067_v19, 4 }
  0xbb   : > { %736 = vrot.lane.b32.xlu0 %v735_v20, %s886_s6  ;;  %726 = vrot.lane.b32.xlu1 %v705_v3, %s888_s23 }
  0xbf   : > { %741 = vrot.lane.b32.xlu1 %v735_v20, %s888_s23  ;;  %338 = vperm.xlu0 %745, %v191_v22   ;;  %v317_v22 = vrot.slane %v1058_v17, 4 }
 0x129   : > { %v732_v34 = vpop.permute.xlu0 %731  ;;  %v722_v35 = vpop.permute.xlu1 %721 }
 0x12a   : > { %v734_v39 = vunpack.i.h.bf16 %v732_v34  ;;  %v733_v40 = vunpack.i.l.bf16 %v732_v34  ;;  %v724_v41 = vunpack.i.h.bf16 %v722_v35  ;;  %v723_v42 = vunpack.i.l.bf16 %v722_v35 }
 0x12c   : > { %v261_v47 = vsel %vm260_vm6, %v733_v40, %v734_v39  ;;  %v253_v48 = vsel %vm251_vm3, %v724_v41, %v723_v42  ;;  %v252_v49 = vsel %vm251_vm3, %v723_v42, %v724_v41  ;;  %v262_v50 = vsel %vm260_vm6, %v734_v39, %v733_v40 }
 0x12d   : > { %v737_v51 = vpop.permute.xlu0 %736  ;;  %v727_v52 = vpop.permute.xlu1 %726  ;;  %v255_v53 = vsel %vm1084_vm4, %v1043_v10, %v252_v49  ;;  %v264_v54 = vsel %vm1103_vm8, %v1043_v10, %v262_v50  ;;  %v254_v55 = vsel %vm1088_vm5, %v1050_v12, %v253_v48  ;;  %v263_v56 = vsel %vm1099_vm7, %v1050_v12, %v261_v47 }
 0x12e   : > { %v739_v57 = vunpack.i.h.bf16 %v737_v51  ;;  %v738_v58 = vunpack.i.l.bf16 %v737_v51  ;;  %v729_v59 = vunpack.i.h.bf16 %v727_v52  ;;  %v728_v60 = vunpack.i.l.bf16 %v727_v52 }
 0x12f   : > { %v323_v61 = vsel %vm321_vm9, %v255_v53, %v300_v38  ;;  %v325_v62 = vsel %vm321_vm9, %v264_v54, %v306_v43  ;;  %v322_v63 = vsel %vm321_vm9, %v254_v55, %v299_v44  ;;  %v324_v0 = vsel %vm321_vm9, %v263_v56, %v305_v45 }
 0x130   : > { %v285_v3 = vsel %vm251_vm3, %v738_v58, %v739_v57  ;;  %v286_v4 = vsel %vm251_vm3, %v739_v57, %v738_v58  ;;  %v277_v6 = vsel %vm260_vm6, %v728_v60, %v729_v59  ;;  %v278_v8 = vsel %vm260_vm6, %v729_v59, %v728_v60 }
 0x131   : > { %v279_v9 = vsel %vm1099_vm7, %v1024_v1, %v277_v6  ;;  %v280_v10 = vsel %vm1103_vm8, %v1028_v2, %v278_v8  ;;  %v742_v11 = vpop.permute.xlu1 %741  ;;  %v331_v12 = vpack.c.bf16 %v325_v62, %v323_v61  ;;  %v330_v13 = vpack.c.bf16 %v324_v0, %v322_v63 }
 0x132   : > { %v311_v14 = vrot.slane %v279_v9, 4  ;;  %v312_v15 = vrot.slane %v280_v10, 4  ;;  %v744_v16 = vunpack.i.h.bf16 %v742_v11  ;;  %v743_v18 = vunpack.i.l.bf16 %v742_v11 }
 0x133   : > { %352 = vmatprep.subr.bf16.mxu0 %v331_v12  ;;  %v288_v20 = vsel %vm1084_vm4, %v1067_v19, %v285_v3  ;;  %v287_v21 = vsel %vm1088_vm5, %v1058_v17, %v286_v4 }
 0x134   : > { %v294_v23 = vsel %vm260_vm6, %v744_v16, %v743_v18  ;;  %353 = vmatpush1.bf16.msra.mxu0 %v330_v13  ;;  %v327_v24 = vsel %vm321_vm9, %v1028_v2, %v312_v15  ;;  %v329_v25 = vsel %vm321_vm9, %v288_v20, %v318_v46  ;;  %v326_v26 = vsel %vm321_vm9, %v1024_v1, %v311_v14 }
 0x135   : > { %v333_v27 = vpack.c.bf16 %v329_v25, %v327_v24  ;;  %v328_v28 = vsel %vm321_vm9, %v287_v21, %v317_v22  ;;  %v296_v29 = vsel %vm1103_vm8, %v1067_v19, %v294_v23  ;;  %v293_v32 = vsel %vm260_vm6, %v743_v18, %v744_v16  ;;  %v1176_v19 = vld [vmem:[%s1342_s1] sm:$0x3] }
 0x136   : > { %v332_v33 = vpack.c.bf16 %v328_v28, %v326_v26  ;;  %v335_v34 = vpack.c.bf16 %v296_v29, %v296_v29  ;;  %v295_v2 = vsel %vm1099_vm7, %v1058_v17, %v293_v32 }
 0x137   : > { %354 = vmatprep.subr.bf16.mxu0 %v333_v27  ;;  %v334_v35 = vpack.c.bf16 %v295_v2, %v295_v2 }
 0x138   : > { %355 = vmatpush1.bf16.msra.mxu0 %v332_v33 }
 0x139   : > { %643 = vmatprep.subr.msk.bf16.mxu0 %vm345_vm10, %v335_v34  ;;  %v347_v1 = vsel %vm345_vm10, %v334_v35, 0 }
 0x13c   : > { %357 = vmatpush1.bf16.msra.mxu0 %v347_v1 }
 0x13e   : > { %v1180_v38 = vpop.permute.xlu0 %338 }
 0x13f   : > { %644 = vmatmul.mubr.msk.bf16.vlgmr.msra.gmra.mrb[0].mxu0 %vm341_vm11, %v1176_v19 }
 0x212   : > { %v386_v17 = vpop.f32.mrb[0].mxu0 }
 0x213   : > { %v387_v39 = vadd.f32 %v386_v17, %v1180_v38  ;;  %v388_v40 = vpop.f32.mrb[1].mxu0 }
 0x214   : > { %v389_v41 = vadd.f32 %v388_v40, %v1180_v38  ;;  %v390_v42 = vpop.f32.mrb[2].mxu0 }
 0x215   : > { %v1184_v43 = vmax.f32 %v387_v39, 0.0  ;;  %v391_v44 = vpop.f32.mrb[3].mxu0 }
 0x216   : > { %v1186_v45 = vmax.f32 %v389_v41, 0.0 }
 0x218   : > { %v756_v46 = vpack.i.bf16 %v1186_v45, %v1184_v43 }
 0x21a   : > { %757 = vrot.lane.b32.xlu0 %v756_v46, %s886_s6  ;;  %747 = vrot.lane.b32.xlu1 %v756_v46, %s885_s4  ;;  %s820_s4 = sshll.u32 %s890_s9, 4  ;;  %s821_s4 = int_to_ptr.vmem [resolvable:$false] %s820_s4 }
 0x21b   : > { %p823_p7 = scmp.lt.s32.totalorder %s1299_s26, %s821_s4 }
 0x21e   : > { %752 = vrot.lane.b32.xlu1 %v756_v46, %s887_s7 }
 0x28c   : > { %v748_v47 = vpop.permute.xlu1 %747  ;;  %v758_v61 = vpop.permute.xlu0 %757 }
 0x28d   : > { %v750_v48 = vunpack.i.h.bf16 %v748_v47  ;;  %v749_v49 = vunpack.i.l.bf16 %v748_v47  ;;  %v760_v62 = vunpack.i.h.bf16 %v758_v61  ;;  %v759_v63 = vunpack.i.l.bf16 %v758_v61 }
 0x28f   : > { %v399_v50 = vsel %vm223_vm0, %v749_v49, %v750_v48  ;;  %v400_v51 = vsel %vm223_vm0, %v750_v48, %v749_v49  ;;  %v431_v0 = vsel %vm251_vm3, %v759_v63, %v760_v62  ;;  %v432_v7 = vsel %vm251_vm3, %v760_v62, %v759_v63 }
 0x290   : > { %v401_v52 = vsel %vm223_vm0, %v1184_v43, %v400_v51  ;;  %v753_v53 = vpop.permute.xlu1 %752  ;;  %v434_v3 = vsel %vm1084_vm4, %v1186_v45, %v431_v0  ;;  %v433_v4 = vsel %vm1088_vm5, %v1184_v43, %v432_v7  ;;  %v462_v9 = vrot.slane %v399_v50, 4 }
 0x291   : > { %v755_v54 = vunpack.i.h.bf16 %v753_v53  ;;  %v754_v55 = vunpack.i.l.bf16 %v753_v53  ;;  %v771_v56 = vpack.i.bf16 %v399_v50, %v401_v52  ;;  %v468_v14 = vrot.slane %v434_v3, 4 }
 0x292   : > { %v461_v15 = vrot.slane %v401_v52, 4  ;;  %v467_v16 = vrot.slane %v433_v4, 4 }
 0x293   : > { %v1202_v57 = vsel %vm242_vm2, %v754_v55, %v755_v54  ;;  %v408_v58 = vsel %vm242_vm2, %v755_v54, %v754_v55  ;;  %772 = vrot.lane.b32.xlu0 %v771_v56, %s888_s23  ;;  %762 = vrot.lane.b32.xlu1 %v771_v56, %s886_s6 }
 0x294   : > { %v1211_v59 = vsel %vm226_vm1, %v1186_v45, %v408_v58  ;;  %v479_v58 = vrot.slane %v1202_v57, 4 }
 0x295   : > { %v776_v60 = vpack.i.bf16 %v1211_v59, %v1202_v57  ;;  %v480_v18 = vrot.slane %v1211_v59, 4 }
 0x297   : > { %777 = vrot.lane.b32.xlu0 %v776_v60, %s886_s6  ;;  %767 = vrot.lane.b32.xlu1 %v756_v46, %s888_s23  ;;  %s822_s6 = scalar_lea.vmem %s821_s4, 256 }
 0x298   : > { %p824_p10 = scmp.lt.s32.totalorder %s822_s6, %s816_s16 }
 0x29a   : > { %p825_p2 = por %p824_p10, %p823_p7 }
 0x29b   : > { %782 = vrot.lane.b32.xlu1 %v776_v60, %s888_s23 }
 0x29c   : > { %p826_p4 = pnand %p825_p2, %p819_p13 }
 0x305   : > { %v773_v6 = vpop.permute.xlu0 %772  ;;  %v763_v8 = vpop.permute.xlu1 %762 }
 0x306   : > { %v775_v10 = vunpack.i.h.bf16 %v773_v6  ;;  %v774_v11 = vunpack.i.l.bf16 %v773_v6  ;;  %v765_v12 = vunpack.i.h.bf16 %v763_v8  ;;  %v764_v13 = vunpack.i.l.bf16 %v763_v8 }
 0x308   : > { %v423_v20 = vsel %vm260_vm6, %v774_v11, %v775_v10  ;;  %v416_v21 = vsel %vm251_vm3, %v765_v12, %v764_v13  ;;  %v415_v22 = vsel %vm251_vm3, %v764_v13, %v765_v12  ;;  %v424_v23 = vsel %vm260_vm6, %v775_v10, %v774_v11 }
 0x309   : > { %v778_v24 = vpop.permute.xlu0 %777  ;;  %v768_v25 = vpop.permute.xlu1 %767  ;;  %v418_v26 = vsel %vm1084_vm4, %v399_v50, %v415_v22  ;;  %v426_v27 = vsel %vm1103_vm8, %v399_v50, %v424_v23  ;;  %v417_v28 = vsel %vm1088_vm5, %v401_v52, %v416_v21  ;;  %v425_v29 = vsel %vm1099_vm7, %v401_v52, %v423_v20 }
 0x30a   : > { %v780_v32 = vunpack.i.h.bf16 %v778_v24  ;;  %v779_v33 = vunpack.i.l.bf16 %v778_v24  ;;  %v770_v34 = vunpack.i.h.bf16 %v768_v25  ;;  %v769_v2 = vunpack.i.l.bf16 %v768_v25 }
 0x30b   : > { %v484_v35 = vsel %vm321_vm9, %v418_v26, %v462_v9  ;;  %v486_v1 = vsel %vm321_vm9, %v426_v27, %v468_v14  ;;  %v483_v17 = vsel %vm321_vm9, %v417_v28, %v461_v15  ;;  %v485_v39 = vsel %vm321_vm9, %v425_v29, %v467_v16 }
 0x30c   : > { %v447_v40 = vsel %vm251_vm3, %v779_v33, %v780_v32  ;;  %v448_v41 = vsel %vm251_vm3, %v780_v32, %v779_v33  ;;  %v439_v42 = vsel %vm260_vm6, %v769_v2, %v770_v34  ;;  %v440_v44 = vsel %vm260_vm6, %v770_v34, %v769_v2 }
 0x30d   : > { %v441_v46 = vsel %vm1099_vm7, %v1184_v43, %v439_v42  ;;  %v442_v47 = vsel %vm1103_vm8, %v1186_v45, %v440_v44  ;;  %v783_v48 = vpop.permute.xlu1 %782  ;;  %v492_v49 = vpack.c.bf16 %v486_v1, %v484_v35  ;;  %v491_v50 = vpack.c.bf16 %v485_v39, %v483_v17 }
 0x30e   : > { %v473_v51 = vrot.slane %v441_v46, 4  ;;  %v474_v52 = vrot.slane %v442_v47, 4  ;;  %v785_v53 = vunpack.i.h.bf16 %v783_v48  ;;  %v784_v54 = vunpack.i.l.bf16 %v783_v48 }
 0x30f   : > { %503 = vmatprep.subr.bf16.mxu1 %v492_v49  ;;  %v450_v55 = vsel %vm1084_vm4, %v1211_v59, %v447_v40  ;;  %v449_v56 = vsel %vm1088_vm5, %v1202_v57, %v448_v41 }
 0x310   : > { %v455_v60 = vsel %vm260_vm6, %v784_v54, %v785_v53  ;;  %v456_v61 = vsel %vm260_vm6, %v785_v53, %v784_v54  ;;  %504 = vmatpush1.bf16.msra.mxu1 %v491_v50  ;;  %v488_v62 = vsel %vm321_vm9, %v1186_v45, %v474_v52  ;;  %v490_v30 = vsel %vm321_vm9, %v450_v55, %v480_v18 }
 0x311   : > { %v458_v31 = vsel %vm1103_vm8, %v1211_v59, %v456_v61  ;;  %v494_v63 = vpack.c.bf16 %v490_v30, %v488_v62  ;;  %v487_v0 = vsel %vm321_vm9, %v1184_v43, %v473_v51  ;;  %v489_v7 = vsel %vm321_vm9, %v449_v56, %v479_v58 }
 0x312   : > { %v493_v5 = vpack.c.bf16 %v489_v7, %v487_v0  ;;  %v496_v3 = vpack.c.bf16 %v458_v31, %v458_v31  ;;  %v457_v45 = vsel %vm1099_vm7, %v1202_v57, %v455_v60 }
 0x313   : > { %505 = vmatprep.subr.bf16.mxu1 %v494_v63  ;;  %v495_v4 = vpack.c.bf16 %v457_v45, %v457_v45 }
 0x314   : > { %506 = vmatpush1.bf16.msra.mxu1 %v493_v5 }
 0x315   : > { %645 = vmatprep.subr.msk.bf16.mxu1 %vm345_vm10, %v496_v3  ;;  %v498_v37 = vsel %vm345_vm10, %v495_v4, 0 }
 0x318   : > { %508 = vmatpush1.bf16.msra.mxu1 %v498_v37 }
 0x31b   : > { %646 = vmatmul.mubr.msk.bf16.vlgmr.msra.gmra.mrb[0].mxu1 %vm341_vm11, %v1176_v19 }
 0x3ee   : > { %v537_v43 = vpop.f32.mrb[0].mxu1 }
 0x3ef   : > { %v538_v59 = vadd.f32 %v537_v43, %v1180_v38  ;;  %v539_v6 = vpop.f32.mrb[1].mxu1 }
 0x3f0   : > { %v540_v36 = vadd.f32 %v539_v6, %v1180_v38  ;;  %v541_v57 = vpop.f32.mrb[2].mxu1 }
 0x3f1   : > { %v542_v8 = vpop.f32.mrb[3].mxu1 }
 0x3f2   : > { %v546_v9 = vcombine.low %v538_v59, %v540_v36 }
 0x3f4   : > { %548 = vst [vmem:[%s186_s22] sm:$0xff] %v546_v9 }
 0x3f5   : > { %829 = shalt.err (!%p826_p4)
}
 0x3f6   : > { %s830_s29 = scalar_lea.hbm %s1297_s30, 128  ;;  %s834_s8 = scalar_lea.hbm %s1344_s3, 256 }
 0x3f7   : > { %p831_p5 = scmp.ne.s32.totalorder %s1297_s30, %s830_s29  ;;  %p835_p0 = scmp.lt.u32.totalorder %s1297_s30, %s1344_s3 }
 0x3f8   : > { %p836_p1 = scmp.lt.u32.totalorder %s834_s8, %s830_s29  ;;  %p838_p6 = scmp.lt.u32.totalorder %s830_s29, %s1297_s30 }
 0x3f9   : > { %p832_p8 = pnand %p831_p5, %p1361_p11 }
 0x3fa   : > { %p837_p3 = por %p836_p1, %p835_p0 }
 0x3fb   : > { %p833_p9 = pneg %p832_p8 }
 0x3fc   : > { %p839_p12 = por %p838_p6, %p837_p3 }
 0x3fe   : > { %p840_p13 = pnand %p839_p12, %p833_p9 }
 0x400   : > { %843 = shalt.err (!%p840_p13)
}
 0x401   : > { %656 = dma.vmem_to_hbm [thread:$0]  (%p1361_p11), %s1299_s26, 128, %s1297_s30, %s550_s5  }
 0x402 PF: > { %s576_s17 = sand.u32 1, %s870_s12   ;;  %p1362_p7 = scmp.ne.s32.totalorder %s1349_s25, 0 }
 0x403   : > { %p1363_p10 = scmp.ge.s32.totalorder %s882_s15, 2  ;;  %s577_s19 = scalar_lea.sflag [#allocation4], %s576_s17 }
 0x405   : > { %p663_p2 = pnand %p1363_p10, %p1362_p7 }
 0x407   : > { %865 = dma.done.wait (!%p663_p2), %s577_s19, 128  }
 0x408   : > { %867 = vsyncadd (!%p663_p2), %s577_s19, 4294967168  ;;  %p16_p4 = scmp.ge.s32.totalorder %s936_s18, 4   ;;  %s1364_s12 = smov %s874_s13 }
 0x409   : > { %s1365_s13 = smov %s878_s14  ;;  %s1366_s14 = smov %s948_s21 }
 0x40a   : > { %s1367_s15 = smov %s936_s18  ;;  %18 = sbr.rel (!%p16_p4) target bundleno = 5 (0x5), region = 77 }
 0x411   :  { %582 = vsyncpa [#allocation3], 1 }
 0x412   :  { %584 = vsyncpa [#allocation3 + $0x1], 1 }
 0x413   :  { %585 = vsyncpa [#allocation4], 1 }
 0x414   :  { %587 = vsyncpa [#allocation4 + $0x1], 1 }

</bundles_post_ra>
